<compile_context>
chip_gen: v6e
topology: v6e:2x2x1
jax: 0.10.0
libtpu: 0.0.40
codegen_flags: <defaults>
</compile_context>

<pallas_src>
import jax
import jax.numpy as jnp
from jax.experimental import pallas as pl
from jax.experimental.pallas import tpu as pltpu


def _hard_mish_kernel(x_ref, o_ref):
    x = x_ref[...]
    # 0.5 * x * clamp(x + 2, 0, 2) -- all elementwise VPU ops, stays in input dtype.
    o_ref[...] = (x * (jnp.clip(x + 2.0, 0.0, 2.0) * 0.5)).astype(o_ref.dtype)


def _round_up(v: int, m: int) -> int:
    return ((v + m - 1) // m) * m


def hard_mish_me(x: jax.Array, *, target_block_bytes: int = 8 * 1024 * 1024) -> jax.Array:
    """Elementwise Hard Mish: 0.5 * x * clamp(x + 2, 0, 2). Matches HardMishMe.forward."""
    orig_shape = x.shape
    dtype = x.dtype
    n = x.size
    if n == 0:
        return x

    LANES = 128
    itemsize = jnp.dtype(dtype).itemsize
    # dtype-aware sublane granularity: 8 rows for 32-bit, 16 for 16-bit, 32 for 8-bit.
    row_gran = max(8, 32 // itemsize)

    # Rows needed to hold the flat tensor; only the <128-element lane remainder
    # is ever padded (hard_mish(0) == 0, and it is sliced off below).
    rows = pl.cdiv(n, LANES)
    n_pad = rows * LANES - n

    # Byte-based block rows: ~target_block_bytes of input per grid step, rounded
    # to the native sublane granularity and never larger than the tensor.
    tr = max(row_gran,
             (target_block_bytes // (LANES * itemsize)) // row_gran * row_gran)
    tr = min(tr, _round_up(rows, row_gran))

    # Ensure at least 2 grid steps when possible so the "parallel" axis can be
    # sharded across the two TensorCores on v7x (no-op on single-TC v5e/v6e).
    if rows > row_gran and pl.cdiv(rows, tr) < 2:
        tr = max(row_gran, (rows // 2) // row_gran * row_gran)

    grid = (pl.cdiv(rows, tr),)

    x_flat = x.reshape(-1)
    if n_pad:
        x_flat = jnp.pad(x_flat, (0, n_pad))
    x2d = x_flat.reshape(rows, LANES)

    # Double-buffered in + out blocks, plus headroom for compiler scratch.
    block_bytes = tr * LANES * itemsize
    vmem_limit = int(min(max(4 * block_bytes + (8 << 20), 32 << 20), 100 << 20))

    out2d = pl.pallas_call(
        _hard_mish_kernel,
        out_shape=jax.ShapeDtypeStruct((rows, LANES), dtype),
        grid_spec=pltpu.PrefetchScalarGridSpec(
            num_scalar_prefetch=0,
            grid=grid,
            in_specs=[pl.BlockSpec((tr, LANES), lambda i: (i, 0))],
            out_specs=pl.BlockSpec((tr, LANES), lambda i: (i, 0)),
        ),
        compiler_params=pltpu.CompilerParams(
            dimension_semantics=("parallel",),
            vmem_limit_bytes=vmem_limit,
        ),
        cost_estimate=pl.CostEstimate(
            flops=4 * n,
            transcendentals=0,
            bytes_accessed=2 * n * itemsize,
        ),
    )(x2d)

    out_flat = out2d.reshape(-1)
    if n_pad:
        out_flat = out_flat[:n]
    return out_flat.reshape(orig_shape)


def _hard_mish_ref(x):
    return (0.5 * x * jnp.clip(x + 2.0, 0.0, 2.0)).astype(x.dtype)


if __name__ == "__main__":
    key = jax.random.PRNGKey(0)

    # NCHW, matching PyTorch conv-style activations (aligned case: n = 2048).
    x = jax.random.normal(key, (2, 4, 16, 16), dtype=jnp.float32) * 3.0
    y = hard_mish_me(x)
    jax.block_until_ready(y)
    y_ref = _hard_mish_ref(x)
    assert y.shape == x.shape and y.dtype == x.dtype
    assert jnp.allclose(y, y_ref, atol=1e-6, rtol=1e-6), "f32 aligned mismatch"

    # Unaligned total size (exercises lane-remainder pad + ragged last block).
    k2 = jax.random.PRNGKey(0)
    x2 = jax.random.normal(k2, (3, 5, 7, 9), dtype=jnp.float32) * 3.0
    y2 = hard_mish_me(x2)
    jax.block_until_ready(y2)
    assert y2.shape == x2.shape and y2.dtype == x2.dtype
    assert jnp.allclose(y2, _hard_mish_ref(x2), atol=1e-6, rtol=1e-6), "unaligned mismatch"

    # bf16 path (byte-based tile sizing keeps per-step DMA size dtype-invariant).
    x3 = jax.random.normal(k2, (2, 4, 16, 16), dtype=jnp.bfloat16) * 3.0
    y3 = hard_mish_me(x3)
    jax.block_until_ready(y3)
    assert y3.shape == x3.shape and y3.dtype == x3.dtype
    assert jnp.allclose(y3.astype(jnp.float32), _hard_mish_ref(x3).astype(jnp.float32),
                        atol=2e-2, rtol=2e-2), "bf16 mismatch"

    print("KERNEL_OK")
</pallas_src>

<mosaic_0001>
module attributes {stable_mosaic.version = 11 : i64} {
  func.func @_hard_mish_kernel(%arg0: i32, %arg1: memref<8x128xf32, #tpu.memory_space<vmem>>, %arg2: memref<8x128xf32, #tpu.memory_space<vmem>>) attributes {dimension_semantics = [#tpu.dimension_semantics<parallel>], iteration_bounds = array<i64: 2>, scalar_prefetch = 0 : i64, scratch_operands = 0 : i64, tpu.core_type = #tpu.core_type<tc>, window_params = [{transform_indices = @transform_0, window_bounds = array<i64: 8, 128>}, {transform_indices = @transform_1, window_bounds = array<i64: 8, 128>}]} {
    %c0 = arith.constant 0 : index
    %c0_0 = arith.constant 0 : index
    %0 = vector.load %arg1[%c0, %c0_0] : memref<8x128xf32, #tpu.memory_space<vmem>>, vector<8x128xf32>
    %cst = arith.constant 2.000000e+00 : f32
    %1 = vector.broadcast %cst : f32 to vector<8x128xf32>
    %2 = arith.addf %0, %1 : vector<8x128xf32>
    %cst_1 = arith.constant 0.000000e+00 : f32
    %cst_2 = arith.constant 2.000000e+00 : f32
    %3 = vector.broadcast %cst_1 : f32 to vector<8x128xf32>
    %4 = arith.maximumf %3, %2 : vector<8x128xf32>
    %5 = vector.broadcast %cst_2 : f32 to vector<8x128xf32>
    %6 = arith.minimumf %5, %4 : vector<8x128xf32>
    %cst_3 = arith.constant 5.000000e-01 : f32
    %7 = vector.broadcast %cst_3 : f32 to vector<8x128xf32>
    %8 = arith.mulf %6, %7 : vector<8x128xf32>
    %9 = arith.mulf %0, %8 : vector<8x128xf32>
    %c0_4 = arith.constant 0 : index
    %c0_5 = arith.constant 0 : index
    %10 = vector.load %arg2[%c0_4, %c0_5] : memref<8x128xf32, #tpu.memory_space<vmem>>, vector<8x128xf32>
    tpu.vector_store %arg2[%c0_4, %c0_5], %9 {strides = array<i32>} : memref<8x128xf32, #tpu.memory_space<vmem>>, vector<8x128xf32>,
    return
  }
  func.func @transform_0(%arg0: i32) -> (i32, i32) {
    %c0_i32 = arith.constant 0 : i32
    %c0_i32_0 = arith.constant 0 : i32
    return %arg0, %c0_i32 : i32, i32
  }
  func.func @transform_1(%arg0: i32) -> (i32, i32) {
    %c0_i32 = arith.constant 0 : i32
    %c0_i32_0 = arith.constant 0 : i32
    return %arg0, %c0_i32 : i32, i32
  }
}

</mosaic_0001>

<bundles_post_ra>
// kernel: tpu_custom_call.1
= control target key start
LH: loop header
LB: loop body
LE: loop exit
PB: predicated region body
PF: predicated region fallthrough
CT: control target
= control target key end

     0   :  { %6 = vsyncpa [#allocation3], 0  ;;  %s528_s0 = inlined_call_operand.hbm [shape: f32[16,128], index: 0, kind: input, shape index: {}]   ;;  %s529_s1 = inlined_call_operand.hbm [shape: f32[16,128], index: 1, kind: output, shape index: {}]  }
   0x1   :  { %8 = vsyncpa [#allocation3 + $0x1], 0 }
   0x2   :  { %9 = vsyncpa [#allocation4], 0 }
   0x3   :  { %11 = vsyncpa [#allocation4 + $0x1], 0  ;;  %s387_s6 = smov 0   ;;  %s389_s7 = smov 0  }
   0x4   :  { %s391_s8 = smov 0   ;;  %s393_s9 = smov 0  }
   0x5 LB: > { %s408_s10 = sadd.s32 4294967295, %s373_s9   ;;  %s223_s11 = sadd.s32 4294967294, %s373_s9   ;;  %s373_s9 = sphi %s393_s9, %s546_s9   ;;  %s369_s8 = sphi %s391_s8, %s545_s8   ;;  %s365_s7 = sphi %s389_s7, %s544_s7   ;;  %s361_s6 = sphi %s387_s6, %s543_s6  }
   0x6   : > { %s412_s12 = sadd.s32 1, %s373_s9   ;;  %s24_s13 = sadd.s32 1, %s369_s8 }
   0x7   : > { %s21_s14 = ssub.s32 %s373_s9, %s412_s12  ;;  %p31_p0 = scmp.ne.s32.totalorder %s369_s8, %s365_s7 }
   0x8   : > { %p22_p1 = scmp.eq.s32.totalorder %s21_s14, 0  ;;  %p32_p2 = scmp.eq.s32.totalorder %s373_s9, 0 }
   0x9   : > { %p37_p3 = scmp.ne.s32.totalorder %s365_s7, %s361_s6  ;;  %p38_p4 = scmp.eq.s32.totalorder %s408_s10, 0 }
   0xa   : > { %s424_s15 = scalar_select %p22_p1, %s369_s8, %s24_s13  }
   0xb   : > { %p426_p5 = por %p32_p2, %p31_p0  ;;  %p430_p6 = por %p38_p4, %p37_p3 }
   0xc   : > { %p61_p7 = scmp.eq.s32.totalorder %s408_s10, 1  ;;  %p67_p8 = scmp.eq.s32.totalorder %s223_s11, 1 }
   0xd   : > { %s533_s17 = scalar_select %p430_p6, 1, 0 }
   0xe   : > { %p247_p10 = scmp.lt.s32.totalorder %s373_s9, 2  ;;  %p437_p11 = por %p61_p7, %p31_p0 }
   0xf   : > { %p441_p12 = por %p67_p8, %p37_p3  ;;  %s87_s20 = sand.u32 1, %s369_s8  }
  0x10   : > { %s534_s18 = scalar_select %p437_p11, 1, 0 }
  0x11   : > { %s535_s19 = scalar_select %p441_p12, 1, 0 }
  0x12   : > { %s227_s21 = sshll.u32 %s373_s9, 7  ;;  %s226_s22 = sshll.u32 %s87_s20, 3 }
  0x13   : > { %s450_s25 = scalar_lea.hbm %s528_s0, %s227_s21  ;;  %s91_s26 = scalar_lea.vmem [#allocation2], %s226_s22 }
  0x14   : > { %s98_s27 = sshll.u32 %s91_s26, 4  ;;  %p454_p13 = pnand %p247_p10, %p426_p5  ;;  %s458_s27 = int_to_ptr.vmem [resolvable:$true] %s98_s27 }
  0x15   : > { %s88_s29 = scalar_lea.sflag [#allocation3], %s87_s20  ;;  %s281_s30 = scalar_lea.hbm %s450_s25, 128 }
  0x16   : > { %p282_p2 = scmp.ne.s32.totalorder %s450_s25, %s281_s30  ;;  %p283_p3 = pneg %p454_p13 }
  0x17   : > { %s286_s4 = scalar_lea.hbm %s528_s0, 256  ;;  %p287_p5 = scmp.lt.s32.totalorder %s450_s25, %s528_s0 }
  0x18   : > { %p284_p4 = pnand %p283_p3, %p282_p2  ;;  %p288_p8 = scmp.lt.s32.totalorder %s286_s4, %s281_s30 }
  0x1a   : > { %p285_p7 = pneg %p284_p4  ;;  %p289_p10 = por %p288_p8, %p287_p5 }
  0x1c   : > { %p290_p9 = pnand %p289_p10, %p285_p7 }
  0x1e   : > { %293 = shalt.err (!%p290_p9)
}
  0x1f   : > { %s294_s13 = scalar_lea.vmem %s458_s27, 128  ;;  %s375_s14 = smov [#allocation2]  }
  0x20   : > { %p295_p0 = scmp.ne.s32.totalorder %s458_s27, %s294_s13  ;;  %s299_s16 = sshll.u32 %s375_s14, 4  ;;  %s300_s16 = int_to_ptr.vmem [resolvable:$false] %s299_s16 }
  0x21   : > { %s301_s20 = scalar_lea.vmem %s300_s16, 256  ;;  %p302_p4 = scmp.lt.s32.totalorder %s458_s27, %s300_s16 }
  0x22   : > { %p297_p1 = pnand %p295_p0, %p283_p3  ;;  %p303_p12 = scmp.lt.s32.totalorder %s301_s20, %s294_s13 }
  0x24   : > { %p298_p2 = pneg %p297_p1  ;;  %p304_p11 = por %p303_p12, %p302_p4 }
  0x26   : > { %p305_p6 = pnand %p304_p11, %p298_p2 }
  0x28   : > { %308 = shalt.err (!%p305_p6)
}
  0x29   : > { %242 = dma.hbm_to_vmem [thread:$0]  (!%p454_p13), %s450_s25, 128, %s458_s27, %s88_s29  }
  0x2a   : > { %p537_p9 = scmp.lt.s32.totalorder %s373_s9, 3  ;;  %p538_p7 = scmp.ge.s32.totalorder %s373_s9, 1 }
  0x2c   : > { %p104_p0 = pnand %p538_p7, %p537_p9 }
  0x2d   : > { %s485_s21 = sand.u32 (!%p104_p0), 1, %s365_s7   ;;  %p539_p6 = scmp.ne.s32.totalorder (!%p104_p0), %s533_s17, 0 }
  0x2e   : > { %107 = sbr.rel (%p104_p0) target bundleno = 77 (0x4d), region = 24  ;;  %s229_s22 = sshll.u32 (!%p104_p0), %s485_s21, 3 }
  0x2f   : > { %s110_s23 = scalar_lea.sflag (!%p104_p0), [#allocation3], %s485_s21  ;;  %s113_s24 = scalar_lea.vmem (!%p104_p0), [#allocation2], %s229_s22 }
  0x33   : > { %352 = dma.done.wait (%p539_p6), %s110_s23, 128  }
  0x34   : > { %354 = vsyncadd (%p539_p6), %s110_s23, 4294967168  ;;  %v132_v0 = vld [vmem:[%s113_s24] sm:$0xff]  ;;  %s131_s25 = scalar_lea.vmem [#allocation5], %s229_s22  ;;  %s232_s27 = sshll.u32 %s408_s10, 7 }
  0x35   : > { %v133_v1 = vadd.f32 2.0, %v132_v0  ;;  %s153_s26 = sshll.u32 %s131_s25, 4  ;;  %s151_s30 = scalar_lea.hbm %s529_s1, %s232_s27  ;;  %s154_s26 = int_to_ptr.vmem [resolvable:$true] %s153_s26 }
  0x36   : > { %s140_s17 = scalar_lea.sflag [#allocation4], %s485_s21  ;;  %s309_s2 = scalar_lea.vmem %s154_s26, 128 }
  0x37   : > { %v134_v2 = vmax.f32 %v133_v1, 0.0  ;;  %p310_p11 = scmp.ne.s32.totalorder %s154_s26, %s309_s2  ;;  %p540_p12 = scmp.ne.s32.totalorder %s534_s18, 0 }
  0x38   : > { %s376_s3 = smov [#allocation5]  }
  0x39   : > { %v135_v3 = vmin.f32 %v134_v2, 2.0  ;;  %p311_p13 = pnand %p310_p11, %p540_p12  ;;  %s313_s4 = sshll.u32 %s376_s3, 4  ;;  %s314_s4 = int_to_ptr.vmem [resolvable:$false] %s313_s4 }
  0x3a   : > { %s315_s5 = scalar_lea.vmem %s314_s4, 256  ;;  %p316_p3 = scmp.lt.s32.totalorder %s154_s26, %s314_s4 }
  0x3b   : > { %v136_v4 = vmul.f32 0.5, %v135_v3  ;;  %p312_p1 = pneg %p311_p13  ;;  %p317_p5 = scmp.lt.s32.totalorder %s315_s5, %s309_s2 }
  0x3d   : > { %v137_v5 = vmul.f32 %v136_v4, %v132_v0  ;;  %p318_p8 = por %p317_p5, %p316_p3 }
  0x3f   : > { %138 = vst [vmem:[%s131_s25] sm:$0xff] %v137_v5  ;;  %p319_p10 = pnand %p318_p8, %p312_p1 }
  0x41   : > { %322 = shalt.err (!%p319_p10)
}
  0x42   : > { %s323_s10 = scalar_lea.hbm %s151_s30, 128  ;;  %s327_s14 = scalar_lea.hbm %s529_s1, 256 }
  0x43   : > { %p324_p2 = scmp.ne.s32.totalorder %s151_s30, %s323_s10  ;;  %p328_p7 = scmp.lt.s32.totalorder %s151_s30, %s529_s1 }
  0x44   : > { %p329_p0 = scmp.lt.s32.totalorder %s327_s14, %s323_s10 }
  0x45   : > { %p325_p4 = pnand %p324_p2, %p540_p12 }
  0x46   : > { %p330_p6 = por %p329_p0, %p328_p7 }
  0x47   : > { %p326_p9 = pneg %p325_p4 }
  0x49   : > { %p331_p11 = pnand %p330_p6, %p326_p9 }
  0x4b   : > { %334 = shalt.err (!%p331_p11)
}
  0x4c   : > { %237 = dma.vmem_to_hbm [thread:$0]  (%p540_p12), %s154_s26, 128, %s151_s30, %s140_s17  }
  0x4d PF: > { %s165_s21 = sand.u32 1, %s361_s6   ;;  %p541_p13 = scmp.ne.s32.totalorder %s535_s19, 0 }
  0x4e   : > { %p542_p1 = scmp.ge.s32.totalorder %s373_s9, 2  ;;  %s166_s22 = scalar_lea.sflag [#allocation4], %s165_s21 }
  0x50   : > { %p244_p3 = pnand %p542_p1, %p541_p13 }
  0x52   : > { %p245_p5 = pneg %p244_p3 }
  0x54   : > { %356 = dma.done.wait (%p245_p5), %s166_s22, 128  }
  0x55   : > { %358 = vsyncadd (%p245_p5), %s166_s22, 4294967168  ;;  %p14_p8 = scmp.ge.s32.totalorder %s412_s12, 4   ;;  %s543_s6 = smov %s365_s7 }
  0x56   : > { %s544_s7 = smov %s369_s8  ;;  %s545_s8 = smov %s424_s15 }
  0x57   : > { %s546_s9 = smov %s412_s12  ;;  %16 = sbr.rel (!%p14_p8) target bundleno = 5 (0x5), region = 69 }
  0x5c   :  { %171 = vsyncpa [#allocation3], 1 }
  0x5d   :  { %173 = vsyncpa [#allocation3 + $0x1], 1 }
  0x5e   :  { %174 = vsyncpa [#allocation4], 1 }
  0x5f   :  { %176 = vsyncpa [#allocation4 + $0x1], 1 }

</bundles_post_ra>
